<compile_context>
chip_gen: v6e
topology: v6e:2x2x1
jax: 0.10.0
libtpu: 0.0.40
codegen_flags: <defaults>
</compile_context>

<pallas_src>
import functools

import jax
import jax.numpy as jnp
from jax import lax
from jax.experimental import pallas as pl
from jax.experimental.pallas import tpu as pltpu


def _round_up(x, m):
    return ((x + m - 1) // m) * m


def _cdiv(a, b):
    return (a + b - 1) // b


def _vmem_capacity_bytes():
    try:
        cap = getattr(pltpu.get_tpu_info(), "vmem_capacity_bytes", None)
        if cap:
            return int(cap)
    except Exception:
        pass
    return 64 << 20  # conservative default (v7x per-TC VMEM)


def _pick_row_tile(ns, nt, d, itemsize):
    """Byte-sized row tile: ~2-8 MiB per feature buffer, VMEM-budget aware."""
    cap = _vmem_capacity_bytes()
    # f_s + f_t, each double-buffered -> 4 feature buffers resident; keep them
    # under ~40% of VMEM so W / labels / outputs / compiler scratch fit.
    per_buf_budget = max(1 << 20, int(cap * 0.40) // 4)
    per_buf_target = min(per_buf_budget, 8 << 20)
    align = 16 if itemsize < 4 else 8          # bf16 packs two rows per sublane
    rt = per_buf_target // max(d * itemsize, 1)
    rt = max(align, (rt // align) * align)
    rt = min(rt, _round_up(max(ns, nt), align))
    return int(rt)


def inter_pcd_kernel(fs_ref, ft_ref, lab_ref, w_ref, b_ref, ab_ref, cnt_ref, *,
                     temp, thresh, num_source, num_target, row_tile,
                     tiles_per_core, num_loop_classes):
    core = pl.program_id(0)
    step = pl.program_id(1)
    t = core * tiles_per_core + step          # global row-tile index (UNclamped)

    @pl.when(step == 0)
    def _init():                              # fresh per-core partial accumulators
        ab_ref[...] = jnp.zeros_like(ab_ref)
        cnt_ref[...] = jnp.zeros_like(cnt_ref)

    w = w_ref[...]                            # (D, C)  same dtype as features
    bias = b_ref[...].astype(jnp.float32)     # (1, C)
    c = w.shape[1]
    tb = row_tile

    col = lax.broadcasted_iota(jnp.int32, (tb, c), 1)
    rows = t * row_tile + lax.broadcasted_iota(jnp.int32, (tb, 1), 0)
    dims = (((0,), (0,)), ((), ()))           # contract the row (sublane) dim

    def tempered_direction(y, rowmax):
        # L2-normalized tempered-softmax direction (softmax denom cancels in cos;
        # the reference eps clamp can never fire since ||softmax|| >= 1/sqrt(C)).
        e = jnp.exp((y - rowmax) / temp)
        return e * lax.rsqrt(jnp.sum(e * e, axis=1, keepdims=True))

    # ---------------- source row tile ----------------
    valid_s = rows < num_source               # kills tail pad AND t >= ns_tiles
    y_s = jnp.dot(fs_ref[...], w, preferred_element_type=jnp.float32) + bias
    y_s = jnp.where(valid_s, y_s, 0.0)        # sanitize stale/OOB rows (no NaN/Inf)
    nrm_s = tempered_direction(y_s, jnp.max(y_s, axis=1, keepdims=True))
    lab = lab_ref[...]                        # (tb, 1) i32
    oh_s = jnp.logical_and(lab == col, col < num_loop_classes)
    oh_s = jnp.logical_and(oh_s, valid_s).astype(jnp.float32)
    ab_ref[0, 0] += lax.dot_general(oh_s, nrm_s, dims,
                                    preferred_element_type=jnp.float32)
    cnt_ref[0, 0] += jnp.sum(oh_s, axis=0, keepdims=True)

    # ---------------- target row tile ----------------
    valid_t = rows < num_target
    y_t = jnp.dot(ft_ref[...], w, preferred_element_type=jnp.float32) + bias
    y_t = jnp.where(valid_t, y_t, 0.0)
    rowmax_t = jnp.max(y_t, axis=1, keepdims=True)
    sumexp_t = jnp.sum(jnp.exp(y_t - rowmax_t), axis=1, keepdims=True)
    conf_t = (sumexp_t * thresh) < 1.0        # <=> max softmax prob > thresh
    label_t = jnp.min(jnp.where(y_t == rowmax_t, col, c), axis=1, keepdims=True)
    nrm_t = tempered_direction(y_t, rowmax_t)
    oh_t = jnp.logical_and(label_t == col, conf_t)
    oh_t = jnp.logical_and(oh_t, valid_t).astype(jnp.float32)
    ab_ref[0, 1] += lax.dot_general(oh_t, nrm_t, dims,
                                    preferred_element_type=jnp.float32)
    cnt_ref[0, 1] += jnp.sum(oh_t, axis=0, keepdims=True)


def inter_pcd_forward(f_s, f_t, label_s, w, b, *, temp=10.0, thresh=0.8,
                      num_loop_classes=15, row_tile=None, num_cores=2):
    ns, d = f_s.shape
    nt, _ = f_t.shape
    c = w.shape[1]

    feat_dtype = f_s.dtype
    f_t = f_t.astype(feat_dtype)
    w = w.astype(feat_dtype)                  # bf16 features -> bf16 W (MXU native)
    b2 = jnp.asarray(b, jnp.float32).reshape(1, c)
    labels = label_s.astype(jnp.int32).reshape(ns, 1)

    itemsize = jnp.dtype(feat_dtype).itemsize
    if row_tile is None:
        row_tile = _pick_row_tile(ns, nt, d, itemsize)
    row_tile = max(8, (int(row_tile) // 8) * 8)

    ns_tiles = _cdiv(ns, row_tile)
    nt_tiles = _cdiv(nt, row_tile)
    max_tiles = max(ns_tiles, nt_tiles)
    num_cores = max(1, min(int(num_cores), max_tiles))
    tiles_per_core = _cdiv(max_tiles, num_cores)

    # Clamped index maps: past the end of a domain the block index repeats, so
    # Pallas skips the re-DMA and the masked contribution costs (almost) nothing.
    def fs_map(cc, ii):
        return (jnp.minimum(cc * tiles_per_core + ii, ns_tiles - 1), 0)

    def ft_map(cc, ii):
        return (jnp.minimum(cc * tiles_per_core + ii, nt_tiles - 1), 0)

    kern = functools.partial(
        inter_pcd_kernel, temp=float(temp), thresh=float(thresh),
        num_source=int(ns), num_target=int(nt), row_tile=int(row_tile),
        tiles_per_core=int(tiles_per_core),
        num_loop_classes=int(num_loop_classes))

    # Scoped-VMEM budget: 4 double-buffered feature tiles + W/bias + labels + outs.
    cap = _vmem_capacity_bytes()
    needed = 4 * row_tile * d * itemsize
    needed += 4 * (d * c + c) * itemsize
    needed += 4 * row_tile * 4
    needed += 4 * (2 * c * 128 + 128) * 4
    vmem_limit = int(min(int(cap * 0.9), max(32 << 20, needed + (8 << 20))))

    ab, cnt = pl.pallas_call(
        kern,
        out_shape=(jax.ShapeDtypeStruct((num_cores, 2, c, c), jnp.float32),
                   jax.ShapeDtypeStruct((num_cores, 2, 1, c), jnp.float32)),
        grid_spec=pltpu.PrefetchScalarGridSpec(
            num_scalar_prefetch=0,
            grid=(num_cores, tiles_per_core),
            in_specs=[
                pl.BlockSpec((row_tile, d), fs_map),            # source features
                pl.BlockSpec((row_tile, d), ft_map),            # target features
                pl.BlockSpec((row_tile, 1), fs_map),            # source labels
                pl.BlockSpec((d, c), lambda cc, ii: (0, 0)),    # classifier W
                pl.BlockSpec((1, c), lambda cc, ii: (0, 0)),    # classifier b
            ],
            out_specs=[
                pl.BlockSpec((1, 2, c, c), lambda cc, ii: (cc, 0, 0, 0)),
                pl.BlockSpec((1, 2, 1, c), lambda cc, ii: (cc, 0, 0, 0)),
            ]),
        compiler_params=pltpu.CompilerParams(
            # Leading core axis is independent (per-core output slabs) -> parallel
            # (uses both TCs on v7x); the tile axis reduces into the resident
            # output block -> arbitrary.
            dimension_semantics=("parallel", "arbitrary"),
            vmem_limit_bytes=vmem_limit),
    )(f_s, f_t, labels, w, b2)

    # Tiny cross-core combine + final scalar (cheap, done in plain JAX).
    ab = jnp.sum(ab, axis=0)                  # (2, C, C)
    cnt = jnp.sum(cnt, axis=0)                # (2, 1, C)
    cos_sum = jnp.sum(ab[0] * ab[1])
    count = jnp.sum(cnt[0] * cnt[1])
    loss_sum = count - cos_sum                # == sum over valid pairs of (1 - cos)
    st = jnp.where(count > 0.0, loss_sum / jnp.maximum(count, 1.0), loss_sum)
    return ((temp * temp) * st).reshape(1)    # matches torch.tensor([loss]) shape


def inter_pcd_reference(f_s, f_t, label_s, w, b, *, temp=10.0, thresh=0.8,
                        num_loop_classes=15):
    """Pure-JAX reference mirroring the PyTorch forward."""
    y_s = f_s.astype(jnp.float32) @ w.astype(jnp.float32) + b
    y_t = f_t.astype(jnp.float32) @ w.astype(jnp.float32) + b
    soft_yt1 = jax.nn.softmax(y_t, axis=1)
    max_prob = soft_yt1.max(axis=1)
    label_t = jnp.argmax(soft_yt1, axis=1)
    soft_ys = jax.nn.softmax(y_s / temp, axis=1)
    soft_yt = jax.nn.softmax(y_t / temp, axis=1)

    def norm(x):
        return x / jnp.maximum(jnp.linalg.norm(x, axis=1, keepdims=True), 1e-8)

    cos = norm(soft_ys) @ norm(soft_yt).T
    mask = ((label_s[:, None] == label_t[None, :])
            & (max_prob[None, :] > thresh)
            & (label_s[:, None] >= 0)
            & (label_s[:, None] < num_loop_classes))
    count = jnp.sum(mask.astype(jnp.float32))
    loss_sum = jnp.sum(jnp.where(mask, 1.0 - cos, 0.0))
    st = jnp.where(count > 0, loss_sum / jnp.maximum(count, 1.0), loss_sum)
    return (temp ** 2 * st).reshape(1)


if __name__ == "__main__":
    NS, NT, D, C = 20, 28, 64, 15             # deliberately not tile multiples
    key = jax.random.PRNGKey(0)
    k1, k2, k3, k4, k5 = jax.random.split(key, 5)

    f_s = jax.random.normal(k1, (NS, D), dtype=jnp.float32)
    f_t = jax.random.normal(k2, (NT, D), dtype=jnp.float32)
    label_s = jax.random.randint(k3, (NS,), 0, C, dtype=jnp.int32)
    # deterministic synthetic classifier parameters (linear D -> C)
    w = jax.random.normal(k4, (D, C), dtype=jnp.float32)
    bias = 0.01 * jax.random.normal(k5, (C,), dtype=jnp.float32)

    # thresh=0.8 is the module default; thresh=0.0 guarantees the non-empty pair
    # path is exercised.  row_tile=8 + num_cores=2 exercises multi-step
    # accumulation, clamped index maps, partial tail tiles and per-core slabs.
    for thr in (0.8, 0.0):
        out = inter_pcd_forward(f_s, f_t, label_s, w, bias, thresh=thr,
                                row_tile=8, num_cores=2)
        jax.block_until_ready(out)
        ref = inter_pcd_reference(f_s, f_t, label_s, w, bias, thresh=thr)
        assert jnp.allclose(out, ref, rtol=1e-4, atol=1e-4), (thr, out, ref)

    # auto (byte-sized) row-tile path: single tile per domain at these shapes.
    out1 = inter_pcd_forward(f_s, f_t, label_s, w, bias, thresh=0.0)
    jax.block_until_ready(out1)
    ref1 = inter_pcd_reference(f_s, f_t, label_s, w, bias, thresh=0.0)
    assert jnp.allclose(out1, ref1, rtol=1e-4, atol=1e-4), (out1, ref1)

    # bf16 feature path (halves HBM traffic of the dominant feature read).
    # Discrete decisions (argmax / threshold) may differ slightly from the f32
    # reference, so only check it runs and is finite.
    out_bf16 = inter_pcd_forward(f_s.astype(jnp.bfloat16),
                                 f_t.astype(jnp.bfloat16),
                                 label_s, w, bias, thresh=0.0)
    jax.block_until_ready(out_bf16)
    assert bool(jnp.isfinite(out_bf16).all())

    print("KERNEL_OK")
</pallas_src>

<mosaic_0001>
module attributes {stable_mosaic.version = 11 : i64} {
  func.func @inter_pcd_kernel(%arg0: i32, %arg1: i32, %arg2: memref<8x64xf32, #tpu.memory_space<vmem>>, %arg3: memref<8x64xf32, #tpu.memory_space<vmem>>, %arg4: memref<8x1xi32, #tpu.memory_space<vmem>>, %arg5: memref<64x15xf32, #tpu.memory_space<vmem>>, %arg6: memref<1x15xf32, #tpu.memory_space<vmem>>, %arg7: memref<1x2x15x15xf32, #tpu.memory_space<vmem>>, %arg8: memref<1x2x1x15xf32, #tpu.memory_space<vmem>>) attributes {dimension_semantics = [#tpu.dimension_semantics<parallel>, #tpu.dimension_semantics<arbitrary>], iteration_bounds = array<i64: 2, 2>, scalar_prefetch = 0 : i64, scratch_operands = 0 : i64, tpu.core_type = #tpu.core_type<tc>, window_params = [{transform_indices = @transform_0, window_bounds = array<i64: 8, 64>}, {transform_indices = @transform_1, window_bounds = array<i64: 8, 64>}, {transform_indices = @transform_2, window_bounds = array<i64: 8, 1>}, {pipeline_mode = #tpu.pipeline_mode<synchronous>, transform_indices = @transform_3, window_bounds = array<i64: 64, 15>}, {pipeline_mode = #tpu.pipeline_mode<synchronous>, transform_indices = @transform_4, window_bounds = array<i64: 1, 15>}, {transform_indices = @transform_5, window_bounds = array<i64: 1, 2, 15, 15>}, {transform_indices = @transform_6, window_bounds = array<i64: 1, 2, 1, 15>}]} {
    %c2_i32 = arith.constant 2 : i32
    %0 = arith.muli %arg0, %c2_i32 : i32
    %1 = arith.addi %0, %arg1 : i32
    %c0_i32 = arith.constant 0 : i32
    %2 = arith.cmpi eq, %arg1, %c0_i32 : i32
    %3 = arith.extui %2 : i1 to i32
    %c0_i32_0 = arith.constant 0 : i32
    %4 = arith.cmpi ne, %3, %c0_i32_0 : i32
    scf.if %4 {
      %cst_59 = arith.constant 0.000000e+00 : f32
      %121 = vector.broadcast %cst_59 : f32 to vector<1x2x15x15xf32>
      %c0_60 = arith.constant 0 : index
      %c0_61 = arith.constant 0 : index
      %c0_62 = arith.constant 0 : index
      %c0_63 = arith.constant 0 : index
      %122 = vector.load %arg7[%c0_60, %c0_61, %c0_62, %c0_63] : memref<1x2x15x15xf32, #tpu.memory_space<vmem>>, vector<1x2x15x15xf32>
      tpu.vector_store %arg7[%c0_60, %c0_61, %c0_62, %c0_63], %121 {strides = array<i32>} : memref<1x2x15x15xf32, #tpu.memory_space<vmem>>, vector<1x2x15x15xf32>,
      %cst_64 = arith.constant 0.000000e+00 : f32
      %123 = vector.broadcast %cst_64 : f32 to vector<1x2x1x15xf32>
      %c0_65 = arith.constant 0 : index
      %c0_66 = arith.constant 0 : index
      %c0_67 = arith.constant 0 : index
      %c0_68 = arith.constant 0 : index
      %124 = vector.load %arg8[%c0_65, %c0_66, %c0_67, %c0_68] : memref<1x2x1x15xf32, #tpu.memory_space<vmem>>, vector<1x2x1x15xf32>
      tpu.vector_store %arg8[%c0_65, %c0_66, %c0_67, %c0_68], %123 {strides = array<i32>} : memref<1x2x1x15xf32, #tpu.memory_space<vmem>>, vector<1x2x1x15xf32>,
    } else {
    }
    %c0 = arith.constant 0 : index
    %c0_1 = arith.constant 0 : index
    %5 = vector.load %arg5[%c0, %c0_1] : memref<64x15xf32, #tpu.memory_space<vmem>>, vector<64x15xf32>
    %c0_2 = arith.constant 0 : index
    %c0_3 = arith.constant 0 : index
    %6 = vector.load %arg6[%c0_2, %c0_3] : memref<1x15xf32, #tpu.memory_space<vmem>>, vector<1x15xf32>
    %7 = tpu.iota {dimensions = array<i32: 1>} : vector<8x15xi32>
    %c8_i32 = arith.constant 8 : i32
    %8 = arith.muli %1, %c8_i32 : i32
    %9 = tpu.iota {dimensions = array<i32: 0>} : vector<8x1xi32>
    %10 = vector.broadcast %8 : i32 to vector<8x1xi32>
    %11 = arith.addi %10, %9 : vector<8x1xi32>
    %c20_i32 = arith.constant 20 : i32
    %12 = vector.broadcast %c20_i32 : i32 to vector<8x1xi32>
    %13 = arith.cmpi slt, %11, %12 : vector<8x1xi32>
    %c0_4 = arith.constant 0 : index
    %c0_5 = arith.constant 0 : index
    %14 = vector.load %arg2[%c0_4, %c0_5] : memref<8x64xf32, #tpu.memory_space<vmem>>, vector<8x64xf32>
    %cst = arith.constant dense<0.000000e+00> : vector<8x15xf32>
    %15 = tpu.matmul %14, %5, %cst {dimension_numbers = #tpu.dot_dimension_numbers<[1], [0], [0], [1], [0, 0, 1, 1], [], []>} : vector<8x64xf32>, vector<64x15xf32>, vector<8x15xf32> -> vector<8x15xf32>
    %16 = vector.broadcast %6 : vector<1x15xf32> to vector<8x15xf32>
    %17 = arith.addf %15, %16 : vector<8x15xf32>
    %cst_6 = arith.constant 0.000000e+00 : f32
    %18 = vector.shape_cast %13 : vector<8x1xi1> to vector<8x1xi1>
    %19 = vector.broadcast %18 : vector<8x1xi1> to vector<8x15xi1>
    %20 = vector.broadcast %cst_6 : f32 to vector<8x15xf32>
    %21 = arith.select %19, %17, %20 : vector<8x15xi1>, vector<8x15xf32>
    %cst_7 = arith.constant dense<0xFF800000> : vector<8xf32>
    %22 = vector.multi_reduction <maximumf>, %21, %cst_7 [1] : vector<8x15xf32> to vector<8xf32>
    %23 = vector.shape_cast %22 : vector<8xf32> to vector<8x1xf32>
    %24 = vector.broadcast %23 : vector<8x1xf32> to vector<8x15xf32>
    %25 = arith.subf %21, %24 : vector<8x15xf32>
    %cst_8 = arith.constant 1.000000e+01 : f32
    %26 = vector.broadcast %cst_8 : f32 to vector<8x15xf32>
    %27 = arith.divf %25, %26 : vector<8x15xf32>
    %28 = math.exp %27 : vector<8x15xf32>
    %29 = arith.mulf %28, %28 : vector<8x15xf32>
    %cst_9 = arith.constant dense<0.000000e+00> : vector<8xf32>
    %30 = vector.multi_reduction <add>, %29, %cst_9 [1] : vector<8x15xf32> to vector<8xf32>
    %31 = vector.shape_cast %30 : vector<8xf32> to vector<8x1xf32>
    %32 = math.rsqrt %31 : vector<8x1xf32>
    %33 = vector.broadcast %32 : vector<8x1xf32> to vector<8x15xf32>
    %34 = arith.mulf %28, %33 : vector<8x15xf32>
    %c0_10 = arith.constant 0 : index
    %c0_11 = arith.constant 0 : index
    %35 = vector.load %arg4[%c0_10, %c0_11] : memref<8x1xi32, #tpu.memory_space<vmem>>, vector<8x1xi32>
    %36 = vector.broadcast %35 : vector<8x1xi32> to vector<8x15xi32>
    %37 = arith.cmpi eq, %36, %7 : vector<8x15xi32>
    %c15_i32 = arith.constant 15 : i32
    %38 = vector.broadcast %c15_i32 : i32 to vector<8x15xi32>
    %39 = arith.cmpi slt, %7, %38 : vector<8x15xi32>
    %40 = arith.andi %37, %39 : vector<8x15xi1>
    %41 = vector.broadcast %13 : vector<8x1xi1> to vector<8x15xi1>
    %42 = arith.andi %40, %41 : vector<8x15xi1>
    %43 = arith.extui %42 : vector<8x15xi1> to vector<8x15xi32>
    %44 = arith.sitofp %43 : vector<8x15xi32> to vector<8x15xf32>
    %c0_12 = arith.constant 0 : index
    %c0_13 = arith.constant 0 : index
    %c0_14 = arith.constant 0 : index
    %c0_15 = arith.constant 0 : index
    %45 = vector.load %arg7[%c0_12, %c0_13, %c0_14, %c0_15] : memref<1x2x15x15xf32, #tpu.memory_space<vmem>>, vector<1x1x15x15xf32>
    %46 = vector.shape_cast %45 : vector<1x1x15x15xf32> to vector<15x15xf32>
    %cst_16 = arith.constant dense<0.000000e+00> : vector<15x15xf32>
    %47 = tpu.matmul %44, %34, %cst_16 {dimension_numbers = #tpu.dot_dimension_numbers<[0], [0], [1], [1], [0, 1, 1, 1], [], []>} : vector<8x15xf32>, vector<8x15xf32>, vector<15x15xf32> -> vector<15x15xf32>
    %48 = arith.addf %46, %47 : vector<15x15xf32>
    %c0_17 = arith.constant 0 : index
    %c0_18 = arith.constant 0 : index
    %c0_19 = arith.constant 0 : index
    %c0_20 = arith.constant 0 : index
    %49 = vector.load %arg7[%c0_17, %c0_18, %c0_19, %c0_20] : memref<1x2x15x15xf32, #tpu.memory_space<vmem>>, vector<1x1x15x15xf32>
    %50 = vector.shape_cast %49 : vector<1x1x15x15xf32> to vector<15x15xf32>
    %51 = vector.shape_cast %48 : vector<15x15xf32> to vector<1x1x15x15xf32>
    tpu.vector_store %arg7[%c0_17, %c0_18, %c0_19, %c0_20], %51 {strides = array<i32>} : memref<1x2x15x15xf32, #tpu.memory_space<vmem>>, vector<1x1x15x15xf32>,
    %c0_21 = arith.constant 0 : index
    %c0_22 = arith.constant 0 : index
    %c0_23 = arith.constant 0 : index
    %c0_24 = arith.constant 0 : index
    %52 = vector.load %arg8[%c0_21, %c0_22, %c0_23, %c0_24] : memref<1x2x1x15xf32, #tpu.memory_space<vmem>>, vector<1x1x1x15xf32>
    %53 = vector.shape_cast %52 : vector<1x1x1x15xf32> to vector<1x15xf32>
    %cst_25 = arith.constant dense<0.000000e+00> : vector<15xf32>
    %54 = vector.multi_reduction <add>, %44, %cst_25 [0] : vector<8x15xf32> to vector<15xf32>
    %55 = vector.shape_cast %54 : vector<15xf32> to vector<1x15xf32>
    %56 = arith.addf %53, %55 : vector<1x15xf32>
    %c0_26 = arith.constant 0 : index
    %c0_27 = arith.constant 0 : index
    %c0_28 = arith.constant 0 : index
    %c0_29 = arith.constant 0 : index
    %57 = vector.load %arg8[%c0_26, %c0_27, %c0_28, %c0_29] : memref<1x2x1x15xf32, #tpu.memory_space<vmem>>, vector<1x1x1x15xf32>
    %58 = vector.shape_cast %57 : vector<1x1x1x15xf32> to vector<1x15xf32>
    %59 = vector.shape_cast %56 : vector<1x15xf32> to vector<1x1x1x15xf32>
    tpu.vector_store %arg8[%c0_26, %c0_27, %c0_28, %c0_29], %59 {strides = array<i32>} : memref<1x2x1x15xf32, #tpu.memory_space<vmem>>, vector<1x1x1x15xf32>,
    %c28_i32 = arith.constant 28 : i32
    %60 = vector.broadcast %c28_i32 : i32 to vector<8x1xi32>
    %61 = arith.cmpi slt, %11, %60 : vector<8x1xi32>
    %c0_30 = arith.constant 0 : index
    %c0_31 = arith.constant 0 : index
    %62 = vector.load %arg3[%c0_30, %c0_31] : memref<8x64xf32, #tpu.memory_space<vmem>>, vector<8x64xf32>
    %cst_32 = arith.constant dense<0.000000e+00> : vector<8x15xf32>
    %63 = tpu.matmul %62, %5, %cst_32 {dimension_numbers = #tpu.dot_dimension_numbers<[1], [0], [0], [1], [0, 0, 1, 1], [], []>} : vector<8x64xf32>, vector<64x15xf32>, vector<8x15xf32> -> vector<8x15xf32>
    %64 = vector.broadcast %6 : vector<1x15xf32> to vector<8x15xf32>
    %65 = arith.addf %63, %64 : vector<8x15xf32>
    %cst_33 = arith.constant 0.000000e+00 : f32
    %66 = vector.shape_cast %61 : vector<8x1xi1> to vector<8x1xi1>
    %67 = vector.broadcast %66 : vector<8x1xi1> to vector<8x15xi1>
    %68 = vector.broadcast %cst_33 : f32 to vector<8x15xf32>
    %69 = arith.select %67, %65, %68 : vector<8x15xi1>, vector<8x15xf32>
    %cst_34 = arith.constant dense<0xFF800000> : vector<8xf32>
    %70 = vector.multi_reduction <maximumf>, %69, %cst_34 [1] : vector<8x15xf32> to vector<8xf32>
    %71 = vector.shape_cast %70 : vector<8xf32> to vector<8x1xf32>
    %72 = vector.broadcast %71 : vector<8x1xf32> to vector<8x15xf32>
    %73 = arith.subf %69, %72 : vector<8x15xf32>
    %74 = math.exp %73 : vector<8x15xf32>
    %cst_35 = arith.constant dense<0.000000e+00> : vector<8xf32>
    %75 = vector.multi_reduction <add>, %74, %cst_35 [1] : vector<8x15xf32> to vector<8xf32>
    %76 = vector.shape_cast %75 : vector<8xf32> to vector<8x1xf32>
    %cst_36 = arith.constant 8.000000e-01 : f32
    %77 = vector.broadcast %cst_36 : f32 to vector<8x1xf32>
    %78 = arith.mulf %76, %77 : vector<8x1xf32>
    %cst_37 = arith.constant 1.000000e+00 : f32
    %79 = vector.broadcast %cst_37 : f32 to vector<8x1xf32>
    %80 = arith.cmpf olt, %78, %79 : vector<8x1xf32>
    %81 = vector.broadcast %71 : vector<8x1xf32> to vector<8x15xf32>
    %82 = arith.cmpf oeq, %69, %81 : vector<8x15xf32>
    %c15_i32_38 = arith.constant 15 : i32
    %83 = vector.broadcast %c15_i32_38 : i32 to vector<8x15xi32>
    %84 = arith.select %82, %7, %83 : vector<8x15xi1>, vector<8x15xi32>
    %cst_39 = arith.constant dense<2147483647> : vector<8xi32>
    %85 = vector.multi_reduction <minsi>, %84, %cst_39 [1] : vector<8x15xi32> to vector<8xi32>
    %86 = vector.shape_cast %85 : vector<8xi32> to vector<8x1xi32>
    %87 = vector.broadcast %71 : vector<8x1xf32> to vector<8x15xf32>
    %88 = arith.subf %69, %87 : vector<8x15xf32>
    %cst_40 = arith.constant 1.000000e+01 : f32
    %89 = vector.broadcast %cst_40 : f32 to vector<8x15xf32>
    %90 = arith.divf %88, %89 : vector<8x15xf32>
    %91 = math.exp %90 : vector<8x15xf32>
    %92 = arith.mulf %91, %91 : vector<8x15xf32>
    %cst_41 = arith.constant dense<0.000000e+00> : vector<8xf32>
    %93 = vector.multi_reduction <add>, %92, %cst_41 [1] : vector<8x15xf32> to vector<8xf32>
    %94 = vector.shape_cast %93 : vector<8xf32> to vector<8x1xf32>
    %95 = math.rsqrt %94 : vector<8x1xf32>
    %96 = vector.broadcast %95 : vector<8x1xf32> to vector<8x15xf32>
    %97 = arith.mulf %91, %96 : vector<8x15xf32>
    %98 = vector.broadcast %86 : vector<8x1xi32> to vector<8x15xi32>
    %99 = arith.cmpi eq, %98, %7 : vector<8x15xi32>
    %100 = vector.broadcast %80 : vector<8x1xi1> to vector<8x15xi1>
    %101 = arith.andi %99, %100 : vector<8x15xi1>
    %102 = vector.broadcast %61 : vector<8x1xi1> to vector<8x15xi1>
    %103 = arith.andi %101, %102 : vector<8x15xi1>
    %104 = arith.extui %103 : vector<8x15xi1> to vector<8x15xi32>
    %105 = arith.sitofp %104 : vector<8x15xi32> to vector<8x15xf32>
    %c0_42 = arith.constant 0 : index
    %c1 = arith.constant 1 : index
    %c0_43 = arith.constant 0 : index
    %c0_44 = arith.constant 0 : index
    %106 = vector.load %arg7[%c0_42, %c1, %c0_43, %c0_44] : memref<1x2x15x15xf32, #tpu.memory_space<vmem>>, vector<1x1x15x15xf32>
    %107 = vector.shape_cast %106 : vector<1x1x15x15xf32> to vector<15x15xf32>
    %cst_45 = arith.constant dense<0.000000e+00> : vector<15x15xf32>
    %108 = tpu.matmul %105, %97, %cst_45 {dimension_numbers = #tpu.dot_dimension_numbers<[0], [0], [1], [1], [0, 1, 1, 1], [], []>} : vector<8x15xf32>, vector<8x15xf32>, vector<15x15xf32> -> vector<15x15xf32>
    %109 = arith.addf %107, %108 : vector<15x15xf32>
    %c0_46 = arith.constant 0 : index
    %c1_47 = arith.constant 1 : index
    %c0_48 = arith.constant 0 : index
    %c0_49 = arith.constant 0 : index
    %110 = vector.load %arg7[%c0_46, %c1_47, %c0_48, %c0_49] : memref<1x2x15x15xf32, #tpu.memory_space<vmem>>, vector<1x1x15x15xf32>
    %111 = vector.shape_cast %110 : vector<1x1x15x15xf32> to vector<15x15xf32>
    %112 = vector.shape_cast %109 : vector<15x15xf32> to vector<1x1x15x15xf32>
    tpu.vector_store %arg7[%c0_46, %c1_47, %c0_48, %c0_49], %112 {strides = array<i32>} : memref<1x2x15x15xf32, #tpu.memory_space<vmem>>, vector<1x1x15x15xf32>,
    %c0_50 = arith.constant 0 : index
    %c1_51 = arith.constant 1 : index
    %c0_52 = arith.constant 0 : index
    %c0_53 = arith.constant 0 : index
    %113 = vector.load %arg8[%c0_50, %c1_51, %c0_52, %c0_53] : memref<1x2x1x15xf32, #tpu.memory_space<vmem>>, vector<1x1x1x15xf32>
    %114 = vector.shape_cast %113 : vector<1x1x1x15xf32> to vector<1x15xf32>
    %cst_54 = arith.constant dense<0.000000e+00> : vector<15xf32>
    %115 = vector.multi_reduction <add>, %105, %cst_54 [0] : vector<8x15xf32> to vector<15xf32>
    %116 = vector.shape_cast %115 : vector<15xf32> to vector<1x15xf32>
    %117 = arith.addf %114, %116 : vector<1x15xf32>
    %c0_55 = arith.constant 0 : index
    %c1_56 = arith.constant 1 : index
    %c0_57 = arith.constant 0 : index
    %c0_58 = arith.constant 0 : index
    %118 = vector.load %arg8[%c0_55, %c1_56, %c0_57, %c0_58] : memref<1x2x1x15xf32, #tpu.memory_space<vmem>>, vector<1x1x1x15xf32>
    %119 = vector.shape_cast %118 : vector<1x1x1x15xf32> to vector<1x15xf32>
    %120 = vector.shape_cast %117 : vector<1x15xf32> to vector<1x1x1x15xf32>
    tpu.vector_store %arg8[%c0_55, %c1_56, %c0_57, %c0_58], %120 {strides = array<i32>} : memref<1x2x1x15xf32, #tpu.memory_space<vmem>>, vector<1x1x1x15xf32>,
    return
  }
  func.func @transform_0(%arg0: i32, %arg1: i32) -> (i32, i32) {
    %c2_i32 = arith.constant 2 : i32
    %0 = arith.muli %arg0, %c2_i32 : i32
    %1 = arith.addi %0, %arg1 : i32
    %c2_i32_0 = arith.constant 2 : i32
    %2 = arith.minsi %1, %c2_i32_0 : i32
    %c0_i32 = arith.constant 0 : i32
    %c0_i32_1 = arith.constant 0 : i32
    return %2, %c0_i32 : i32, i32
  }
  func.func @transform_1(%arg0: i32, %arg1: i32) -> (i32, i32) {
    %c2_i32 = arith.constant 2 : i32
    %0 = arith.muli %arg0, %c2_i32 : i32
    %1 = arith.addi %0, %arg1 : i32
    %c3_i32 = arith.constant 3 : i32
    %2 = arith.minsi %1, %c3_i32 : i32
    %c0_i32 = arith.constant 0 : i32
    %c0_i32_0 = arith.constant 0 : i32
    return %2, %c0_i32 : i32, i32
  }
  func.func @transform_2(%arg0: i32, %arg1: i32) -> (i32, i32) {
    %c2_i32 = arith.constant 2 : i32
    %0 = arith.muli %arg0, %c2_i32 : i32
    %1 = arith.addi %0, %arg1 : i32
    %c2_i32_0 = arith.constant 2 : i32
    %2 = arith.minsi %1, %c2_i32_0 : i32
    %c0_i32 = arith.constant 0 : i32
    %c0_i32_1 = arith.constant 0 : i32
    return %2, %c0_i32 : i32, i32
  }
  func.func @transform_3(%arg0: i32, %arg1: i32) -> (i32, i32) {
    %c0_i32 = arith.constant 0 : i32
    %c0_i32_0 = arith.constant 0 : i32
    %c0_i32_1 = arith.constant 0 : i32
    return %c0_i32, %c0_i32_0 : i32, i32
  }
  func.func @transform_4(%arg0: i32, %arg1: i32) -> (i32, i32) {
    %c0_i32 = arith.constant 0 : i32
    %c0_i32_0 = arith.constant 0 : i32
    %c0_i32_1 = arith.constant 0 : i32
    return %c0_i32, %c0_i32_0 : i32, i32
  }
  func.func @transform_5(%arg0: i32, %arg1: i32) -> (i32, i32, i32, i32) {
    %c0_i32 = arith.constant 0 : i32
    %c0_i32_0 = arith.constant 0 : i32
    %c0_i32_1 = arith.constant 0 : i32
    %c0_i32_2 = arith.constant 0 : i32
    return %arg0, %c0_i32, %c0_i32_0, %c0_i32_1 : i32, i32, i32, i32
  }
  func.func @transform_6(%arg0: i32, %arg1: i32) -> (i32, i32, i32, i32) {
    %c0_i32 = arith.constant 0 : i32
    %c0_i32_0 = arith.constant 0 : i32
    %c0_i32_1 = arith.constant 0 : i32
    %c0_i32_2 = arith.constant 0 : i32
    return %arg0, %c0_i32, %c0_i32_0, %c0_i32_1 : i32, i32, i32, i32
  }
}

</mosaic_0001>

<bundles_post_ra>
// kernel: tpu_custom_call.1
= control target key start
LH: loop header
LB: loop body
LE: loop exit
PB: predicated region body
PF: predicated region fallthrough
CT: control target
= control target key end

     0   :  { %12 = vsyncpa [#allocation3], 0  ;;  %s1722_s0 = inlined_call_operand.vmem [shape: f32[20,64], index: 0, kind: input, shape index: {}]   ;;  %s1723_s1 = inlined_call_operand.vmem [shape: f32[28,64], index: 1, kind: input, shape index: {}]   ;;  %s1724_s2 = inlined_call_operand.vmem [shape: s32[20,1], index: 2, kind: input, shape index: {}]   ;;  %s1725_s3 = inlined_call_operand.vmem [shape: f32[64,15], index: 3, kind: input, shape index: {}]   ;;  %s1726_s4 = inlined_call_operand.vmem [shape: f32[1,15], index: 4, kind: input, shape index: {}]   ;;  %s1727_s5 = inlined_call_operand.vmem [shape: f32[2,2,15,15], index: 5, kind: output, shape index: {0}]   ;;  %s1728_s6 = inlined_call_operand.hbm [shape: f32[2,2,1,15], index: 6, kind: output, shape index: {1}]  }
   0x1   :  { %14 = vsyncpa [#allocation3 + $0x1], 0  ;;  %s1410_s21 = smov 0   ;;  %s1412_s22 = smov 0  }
   0x2   :  { %s1414_s23 = smov 0   ;;  %s1416_s24 = smov 0  }
   0x3   :  { %s1418_s25 = smov 0   ;;  %s1420_s26 = smov 0  }
   0x4   :  { %s1422_s27 = smov 0   ;;  %s1424_s28 = smov 0  }
   0x5 LB: > { %1736 = sst [smem:[#allocation5_spill]] %s1338_s21  ;;  %s1060_s29 = sadd.s32 4294967295, %s1366_s28   ;;  %s1366_s28 = sphi %s1424_s28, %s20_s28   ;;  %s1362_s27 = sphi %s1422_s27, %s1754_s27   ;;  %s1358_s26 = sphi %s1420_s26, %s1753_s26   ;;  %s1354_s25 = sphi %s1418_s25, %s1752_s25   ;;  %s1350_s24 = sphi %s1416_s24, %s1751_s24   ;;  %s1346_s23 = sphi %s1414_s23, %s1750_s23   ;;  %s1342_s22 = sphi %s1412_s22, %s1756_s22   ;;  %s1338_s21 = sphi %s1410_s21, %s1755_s21  }
   0x6   : > { %1737 = sst [smem:[#allocation6_spill]] %s1346_s23  ;;  %s1061_s30 = sadd.s32 4294967294, %s1366_s28  }
   0x7   : > { %1738 = sst [smem:[#allocation7_spill]] %s1358_s26  ;;  %s29_s7 = sadd.s32 1, %s1358_s26 }
   0x8   : > { %1739 = sst [smem:[#allocation8_spill]] %s1362_s27  ;;  %p30_p0 = scmp.ge.s32.totalorder %s29_s7, 2 }
   0x9   : > { %s32_s8 = sadd.s32 1, %s1362_s27  ;;  %p219_p1 = scmp.ne.s32.totalorder %s1346_s23, %s1342_s22 }
   0xa   : > { %p220_p2 = scmp.eq.s32.totalorder %s1060_s29, 3  ;;  %s1758_s7 = smov (%p30_p0, %s29_s7), 0 }
   0xb   : > { %1740 = sst [smem:[#allocation9_spill]] %s1758_s7  ;;  %s1760_s8 = smov (!%p30_p0, %s32_s8), %s1362_s27 }
   0xc   : > { %p1459_p3 = por %p220_p2, %p219_p1  ;;  %p225_p4 = scmp.ne.s32.totalorder %s1342_s22, %s1338_s21 }
   0xd   : > { %p34_p5 = scmp.ge.s32.totalorder %s1760_s8, 2  ;;  %p226_p6 = scmp.eq.s32.totalorder %s1061_s30, 3 }
   0xe   : > { %p1070_p7 = scmp.ge.s32.totalorder %s1366_s28, 1  ;;  %p295_p8 = scmp.lt.s32.totalorder %s1366_s28, 5 }
   0xf   : > { %s1762_s8 = smov (%p34_p5, %s1760_s8), 0  ;;  %p1469_p9 = por %p226_p6, %p225_p4 }
  0x10   : > { %1742 = sst [smem:[#allocation10_spill]] %s1762_s8  ;;  %p296_p10 = pnand %p1070_p7, %p295_p8 }
  0x11   : > { %s1743_s10 = scalar_select %p1469_p9, 1, 0 }
  0x12   : > { %s206_s11 = ssub.s32 %s1362_s27, %s1762_s8  ;;  %s209_s12 = sadd.s32 1, %s1346_s23 }
  0x13   : > { %1744 = sst [smem:[#allocation11_spill]] %s1743_s10  ;;  %p207_p11 = scmp.eq.s32.totalorder %s206_s11, 0 }
  0x14   : > { %299 = sbr.rel (%p296_p10) target bundleno = 1570 (0x622), region = 40  ;;  %s1729_s14 = sand.u32 (!%p296_p10), 1, %s1342_s22  }
  0x15   : > { %s1477_s13 = scalar_select %p207_p11, %s1346_s23, %s209_s12  }
  0x16   : > { %s1072_s15 = sshll.u32 (!%p296_p10), %s1354_s25, 1  ;;  %s1071_s16 = sshll.u32 (!%p296_p10), %s1729_s14, 1 }
  0x17   : > { %1745 = sst [smem:[#allocation12_spill]] %s1477_s13  ;;  %s1484_s17 = sadd.s32 (!%p296_p10), %s1350_s24, %s1072_s15 }
  0x18   : > { %p351_p12 = scmp.lt.s32.totalorder (!%p296_p10), %s1484_s17, 2  ;;  %p363_p13 = scmp.lt.s32.totalorder (!%p296_p10), %s1484_s17, 3 }
  0x19   : > { %p385_p0 = scmp.lt.s32.totalorder %s1354_s25, 1  ;;  %s1512_s29 = scalar_lea.vmem [#allocation2], %s1071_s16 }
  0x1a   : > { %s352_s18 = scalar_select %p351_p12, %s1484_s17, 2 }
  0x1b   : > { %s364_s19 = scalar_select %p363_p13, %s1484_s17, 3 }
  0x1c   : > { %s1764_s18 = smov (!%p351_p12, %s352_s18), 2  ;;  %p1090_p1 = scmp.ne.s32.totalorder %s1350_s24, 0 }
  0x1d   : > { %s1766_s19 = smov (!%p363_p13, %s364_s19), 3  ;;  %s1076_s20 = sshll.u32 %s1764_s18, 3 }
  0x1e   : > { %s1494_s11 = scalar_lea.vmem %s1722_s0, %s1076_s20  ;;  %s1081_s12 = sshll.u32 %s1766_s19, 3 }
  0x1f   : > { %s1499_s8 = scalar_lea.vmem %s1723_s1, %s1081_s12  ;;  %s1504_s26 = scalar_lea.vmem %s1724_s2, %s1076_s20 }
  0x20   : > { %s386_s13 = scalar_select %p385_p0, %s1354_s25, 1 }
  0x21   : > { %395 = sbr.rel (%p1090_p1) target bundleno = 42 (0x2a), region = 44 }
  0x22   : > { %s1112_s23 = sshll.u32 %s386_s13, 5 }
  0x23   : > { %s1510_s21 = scalar_lea.vmem %s1727_s5, %s1112_s23 }
  0x26   : > { %vm396_vm0 = vcmask 121856   ;;  %vm398_vm1 = vcmask 120832   ;;  %vm402_vm2 = vcmask 114688   ;;  %v1368_v0 = vmov 0.0  }
  0x27   : > { %397 = vst.msk [vmem:[%s1510_s21] sm:$0xff] %vm396_vm0, %v1368_v0  ;;  %400 = vst.msk [vmem:[%s1510_s21 + $0x10] sm:$0xff] %vm396_vm0, %v1368_v0 }
  0x28   : > { %399 = vst.msk [vmem:[%s1510_s21 + $0x8] sm:$0x7f] %vm398_vm1, %v1368_v0  ;;  %401 = vst.msk [vmem:[%s1510_s21 + $0x18] sm:$0x7f] %vm398_vm1, %v1368_v0 }
  0x29   : > { %403 = vst.msk [vmem:[%s1512_s29] sm:$0x1] %vm402_vm2, %v1368_v0  ;;  %404 = vst.msk [vmem:[%s1512_s29 + $0x1] sm:$0x1] %vm402_vm2, %v1368_v0 }
  0x2a PF: > { %v1524_v1 = vld [vmem:[%s1725_s3 + $0x38] sm:$0xff]  ;;  %v1369_v2 = vmov 0.0   ;;  %v1530_v3 = vld [vmem:[%s1725_s3 + $0x30] sm:$0xff]  ;;  %vm1370_vm3 = vmmov 0   ;;  %v1539_v4 = vld [vmem:[%s1725_s3 + $0x28] sm:$0xff]  ;;  %vm429_vm4 = vcmask 523264   ;;  %v414_v12 = vlaneseq }
  0x2b   : > { %1138 = vmatprep.subr.mxu0 %v1369_v2  ;;  %1154 = vmatprep.mubr.msk.f32.mxu0 %vm1370_vm3, %v1369_v2  ;;  %v1546_v5 = vld [vmem:[%s1725_s3 + $0x20] sm:$0xff]  ;;  %v1553_v6 = vld [vmem:[%s1725_s3 + $0x18] sm:$0xff]  ;;  %v1560_v7 = vld [vmem:[%s1725_s3 + $0x10] sm:$0xff]  ;;  %v1371_v11 = vmov 0   ;;  %s1091_s27 = sshll.u32 %s1484_s17, 3  ;;  %vm506_vm6 = vcmask 121856  }
  0x2c   : > { %1139 = vmatpush3.msra.mxu0 %v1524_v1  ;;  %v1567_v8 = vld [vmem:[%s1725_s3 + $0x8] sm:$0xff]  ;;  %v1574_v9 = vld [vmem:[%s1725_s3] sm:$0xff]  ;;  %1263 = vset.pattern.permute.xlu0 %v1371_v11  ;;  %v418_v13 = vshrl.u32 %v414_v12, 7  ;;  %v419_v14 = vstv %s1091_s27  ;;  %v1595_v26 = vand.u32 127, %v414_v12  ;;  %vm661_vm11 = vcmask 114688   ;;  %s1746_s14 = sand.u32 1, %s1342_s22  }
  0x2d   : > { %1140 = vmatprep.subr.mxu0 %v1369_v2  ;;  %v422_v10 = vld [vmem:[%s1494_s11] sm:$0xff]  ;;  %vm565_vm12 = vcmask 64512   ;;  %vm650_vm13 = vcmask 120832   ;;  %s1665_s16 = scalar_lea.sflag [#allocation3], %s1746_s14 }
  0x2e   : > { %1141 = vmatpush3.msra.mxu0 %v1530_v3  ;;  %v1582_v15 = vadd.s32 %v419_v14, %v418_v13  ;;  %v1587_v16 = vld [vmem:[%s1726_s4] ss:$0 sm:$0xff]  ;;  %vm526_vm7 = vcmp.lt.s32.totalorder %v1595_v26, 15 }
  0x2f   : > { %1142 = vmatprep.subr.mxu0 %v1369_v2  ;;  %v521_v22 = vld [vmem:[%s1504_s26] sm:$0xff]  ;;  %v532_v48 = vld [vmem:[%s1510_s21 + $0x8] sm:$0x7f]  ;;  %s1113_s26 = sshll.u32 %s1354_s25, 5  ;;  %s1372_s25 = smov [#allocation2]  }
  0x30   : > { %1143 = vmatpush3.msra.mxu0 %v1539_v4  ;;  %vm421_vm5 = vcmp.lt.s32.totalorder %v1582_v15, 20  ;;  %v652_v39 = vld [vmem:[%s1512_s29] sm:$0x1]  ;;  %vm663_vm14 = vcmp.lt.s32.totalorder %v1582_v15, 28  ;;  %s1659_s13 = scalar_lea.hbm %s1728_s6, %s1113_s26 }
  0x31   : > { %1144 = vmatprep.subr.mxu0 %v1369_v2  ;;  %v664_v47 = vld [vmem:[%s1499_s8] sm:$0xff]  ;;  %s938_s8 = sshll.u32 %s1512_s29, 4  ;;  %s1661_s8 = int_to_ptr.vmem [resolvable:$true] %s938_s8 }
  0x32   : > { %1145 = vmatpush3.msra.mxu0 %v1546_v5  ;;  %v531_v50 = vld [vmem:[%s1510_s21] sm:$0xff]  ;;  %s1274_s19 = scalar_lea.vmem %s1661_s8, 32 }
  0x33   : > { %1146 = vmatprep.subr.mxu0 %v1369_v2  ;;  %p1275_p2 = scmp.ne.s32.totalorder %s1661_s8, %s1274_s19 }
  0x34   : > { %1147 = vmatpush3.msra.mxu0 %v1553_v6 }
  0x35   : > { %1148 = vmatprep.subr.mxu0 %v1369_v2  ;;  %p1276_p4 = pnand %p1275_p2, %p1459_p3 }
  0x36   : > { %1149 = vmatpush3.msra.mxu0 %v1560_v7 }
  0x37   : > { %1150 = vmatprep.subr.mxu0 %v1369_v2  ;;  %p1277_p5 = pneg %p1276_p4 }
  0x38   : > { %1151 = vmatpush3.msra.mxu0 %v1567_v8 }
  0x39   : > { %1152 = vmatprep.subr.mxu0 %v1369_v2 }
  0x3a   : > { %1153 = vmatpush3.msra.mxu0 %v1574_v9 }
  0x3b   : > { %1155 = vmatmul.mubr.msk.f32.vlgmr.msra.gmra.mxu0 %vm429_vm4, %v422_v10 }
  0xfb   : > { %v499_v17 = vpop.f32.mrf.mxu0 }
  0xfc   : > { %v500_v18 = vadd.f32 %v1587_v16, %v499_v17 }
  0xfd   : > { %v1156_v19 = vpop.f32.mrf.mxu0 }
  0xfe   : > { %v505_v20 = vsel %vm421_vm5, %v500_v18, 0.0 }
  0xff   : > { %v507_v21 = vsel %vm506_vm6, %v505_v20, -inf }
 0x100   : > { %508 = vmax.xlane.f32.xlu0 %v507_v21 }
 0x116   : > { %523 = vperm.xlu0 %1263, %v521_v22  }
 0x189   : > { %v509_v23 = vpop.xlane.xlu0 %508 }
 0x18a   : > { %v510_v24 = vsub.f32 %v505_v20, %v509_v23 }
 0x18c   : > { %v512_v25 = vmul.f32 0.1, %v510_v24 }
 0x18e   : > { %v513_v27 = vmul.f32 1.442695, %v512_v25 }
 0x190   : > { %1264 = vpow2.f32 %v513_v27 }
 0x191   : > { %v524_v28 = vpop.permute.xlu0 %523 }
 0x192   : > { %vm525_vm8 = vcmp.eq.s32.totalorder %v524_v28, %v1595_v26 }
 0x193   : > { %vm527_vm9 = vmand %vm525_vm8, %vm526_vm7 }
 0x194   : > { %vm528_vm10 = vmand %vm527_vm9, %vm421_vm5 }
 0x195   : > { %v1094_v29 = vsel %vm528_vm10, 1.0, %v1369_v2 }
 0x196   : > { %v653_v30 = vsel %vm506_vm6, %v1094_v29, 0.0 }
 0x197   : > { %v654_v31 = vrot.slane %v653_v30, 4 }
 0x199   : > { %v655_v32 = vadd.f32 %v654_v31, %v653_v30  ;;  %v1105_v30 = vld [vmem:[%s1512_s29 + $0x1] sm:$0x1] }
 0x19b   : > { %v656_v33 = vrot.slane %v655_v32, 2 }
 0x19d   : > { %v1265_v34 = vpop.eup %1264  ;;  %v657_v35 = vadd.f32 %v656_v33, %v655_v32 }
 0x19e   : > { %v515_v36 = vmul.f32 %v1265_v34, %v1265_v34 }
 0x19f   : > { %v658_v37 = vrot.slane %v657_v35, 1 }
 0x1a0   : > { %v516_v38 = vsel %vm506_vm6, %v515_v36, 0.0 }
 0x1a1   : > { %517 = vadd.xlane.f32.xlu1 %v516_v38  ;;  %v659_v40 = vadd.f32 %v658_v37, %v657_v35 }
 0x1a3   : > { %v660_v41 = vadd.f32 %v659_v40, %v652_v39 }
 0x1a5   : > { %662 = vst.msk [vmem:[%s1512_s29] sm:$0x1] %vm661_vm11, %v660_v41 }
 0x1d4   : > { %533 = vxpose.xlu1.b32.start.end [1/1] (short) (narrow) %v1094_v29, 16 }
 0x22a   : > { %v518_v42 = vpop.xlane.xlu1 %517 }
 0x22b   : > { %1266 = vrsqrt.f32 %v518_v42 }
 0x238   : > { %v1267_v43 = vpop.eup %1266 }
 0x239   : > { %v520_v44 = vmul.f32 %v1267_v43, %v1265_v34 }
 0x23b   : > { %1157 = vmatprep.subr.mxu1 %v520_v44 }
 0x23c   : > { %1158 = vmatpush3.msra.mxu1 %v520_v44 }
 0x23d   : > { %1162 = vmatprep.subr.mxu1 %v1369_v2 }
 0x250   : > { %v549_v45 = vpop.trf.xlu1 }
 0x251   : > { %1159 = vmatprep.mubr.msk.f32.mxu1 %vm565_vm12, %v549_v45 }
 0x254   : > { %v550_v46 = vpop.trf.xlu1 }
 0x255   : > { %1160 = vmatmul.mubr.msk.f32.vlgmr.msra.gmra.mxu1 %vm565_vm12, %v550_v46 }
 0x256   : > { %1163 = vmatpush3.msra.mxu1 %v1524_v1  ;;  %1178 = vmatprep.mubr.msk.f32.mxu1 %vm1370_vm3, %v1369_v2 }
 0x257   : > { %1164 = vmatprep.subr.mxu1 %v1369_v2 }
 0x258   : > { %1165 = vmatpush3.msra.mxu1 %v1530_v3 }
 0x259   : > { %1166 = vmatprep.subr.mxu1 %v1369_v2 }
 0x25a   : > { %1167 = vmatpush3.msra.mxu1 %v1539_v4 }
 0x25b   : > { %1168 = vmatprep.subr.mxu1 %v1369_v2 }
 0x25c   : > { %1169 = vmatpush3.msra.mxu1 %v1546_v5 }
 0x25d   : > { %1170 = vmatprep.subr.mxu1 %v1369_v2 }
 0x25e   : > { %1171 = vmatpush3.msra.mxu1 %v1553_v6 }
 0x25f   : > { %1172 = vmatprep.subr.mxu1 %v1369_v2 }
 0x260   : > { %1173 = vmatpush3.msra.mxu1 %v1560_v7 }
 0x261   : > { %1174 = vmatprep.subr.mxu1 %v1369_v2 }
 0x262   : > { %1175 = vmatpush3.msra.mxu1 %v1567_v8 }
 0x263   : > { %1176 = vmatprep.subr.mxu1 %v1369_v2 }
 0x264   : > { %1177 = vmatpush3.msra.mxu1 %v1574_v9 }
 0x265   : > { %1179 = vmatmul.mubr.msk.f32.vlgmr.msra.gmra.mxu1 %vm429_vm4, %v664_v47 }
 0x315   : > { %v1161_v49 = vpop.f32.mrf.mxu1 }
 0x316   : > { %v648_v51 = vadd.f32 %v1161_v49, %v532_v48 }
 0x317   : > { %v638_v52 = vpop.f32.mrf.mxu1 }
 0x318   : > { %651 = vst.msk [vmem:[%s1510_s21 + $0x8] sm:$0x7f] %vm650_vm13, %v648_v51  ;;  %v647_v53 = vadd.f32 %v638_v52, %v531_v50 }
 0x31a   : > { %649 = vst.msk [vmem:[%s1510_s21] sm:$0xff] %vm506_vm6, %v647_v53 }
 0x325   : > { %v734_v54 = vpop.f32.mrf.mxu1 }
 0x326   : > { %v735_v55 = vadd.f32 %v1587_v16, %v734_v54 }
 0x327   : > { %v1180_v56 = vpop.f32.mrf.mxu1 }
 0x328   : > { %v740_v57 = vsel %vm663_vm14, %v735_v55, 0.0 }
 0x329   : > { %v741_v58 = vsel %vm506_vm6, %v740_v57, -inf }
 0x32a   : > { %742 = vmax.xlane.f32.xlu0 %v741_v58 }
 0x3b3   : > { %v743_v59 = vpop.xlane.xlu0 %742 }
 0x3b4   : > { %vm752_vm15 = vcmp.eq.f32.partialorder %v740_v57, %v743_v59  ;;  %v744_v0 = vsub.f32 %v740_v57, %v743_v59 }
 0x3b5   : > { %v753_v60 = vsel %vm752_vm15, %v1595_v26, 15 }
 0x3b6   : > { %v754_v61 = vsel %vm506_vm6, %v753_v60, 2147483647  ;;  %v769_v1 = vmul.f32 0.1, %v744_v0  ;;  %v745_v3 = vmul.f32 1.442695, %v744_v0 }
 0x3b7   : > { %v756_v62 = vshra.s32 %v754_v61, 16  ;;  %v755_v5 = vand.u32 65535, %v754_v61 }
 0x3b8   : > { %v770_v4 = vmul.f32 1.442695, %v769_v1  ;;  %1268 = vpow2.f32 %v745_v3 }
 0x3b9   : > { %v758_v63 = vcvt.s32.f32 %v756_v62  ;;  %v757_v7 = vcvt.s32.f32 %v755_v5 }
 0x3ba   : > { %1270 = vpow2.f32 %v770_v4 }
 0x3bb   : > { %759 = vmin.xlane.f32.xlu1 %v758_v63 }
 0x3c5   : > { %v1269_v8 = vpop.eup %1268 }
 0x3c6   : > { %v747_v11 = vsel %vm506_vm6, %v1269_v8, 0.0 }
 0x3c7   : > { %v1271_v10 = vpop.eup %1270 }
 0x3c8   : > { %v772_v12 = vmul.f32 %v1271_v10, %v1271_v10 }
 0x3ca   : > { %v773_v13 = vsel %vm506_vm6, %v772_v12, 0.0 }
 0x444   : > { %v760_v6 = vpop.xlane.xlu1 %759 }
 0x445   : > { %vm761_vm0 = vcmp.eq.f32.partialorder %v758_v63, %v760_v6  ;;  %v766_v14 = vcvt.f32.s32 %v760_v6 }
 0x446   : > { %v762_v9 = vsel %vm761_vm0, %v757_v7, inf }
 0x447   : > { %763 = vmin.xlane.f32.xlu0 %v762_v9  ;;  %v767_v17 = vshll.u32 %v766_v14, 16 }
 0x44b   : > { %748 = vadd.xlane.f32.xlu0 %v747_v11 }
 0x44f   : > { %774 = vadd.xlane.f32.xlu0 %v773_v13 }
 0x4d0   : > { %v764_v16 = vpop.xlane.xlu0 %763 }
 0x4d1   : > { %v765_v18 = vcvt.f32.s32 %v764_v16 }
 0x4d3   : > { %v768_v19 = vadd.s32 %v767_v17, %v765_v18 }
 0x4d4   : > { %v749_v20 = vpop.xlane.xlu0 %748 }
 0x4d5   : > { %v750_v21 = vmul.f32 0.8, %v749_v20  ;;  %vm778_vm1 = vcmp.eq.s32.totalorder %v768_v19, %v1595_v26 }
 0x4d7   : > { %vm751_vm2 = vcmp.lt.f32.partialorder %v750_v21, 1.0 }
 0x4d8   : > { %vm781_vm3 = vmand %vm778_vm1, %vm751_vm2  ;;  %v775_v22 = vpop.xlane.xlu0 %774 }
 0x4d9   : > { %1272 = vrsqrt.f32 %v775_v22  ;;  %vm782_vm4 = vmand %vm781_vm3, %vm663_vm14 }
 0x4da   : > { %v1098_v23 = vsel %vm782_vm4, 1.0, %v1369_v2 }
 0x4db   : > { %788 = vxpose.xlu0.b32.start.end [1/1] (short) (narrow) %v1098_v23, 16  ;;  %v907_v24 = vsel %vm506_vm6, %v1098_v23, 0.0 }
 0x4dc   : > { %v908_v25 = vrot.slane %v907_v24, 4 }
 0x4de   : > { %v909_v27 = vadd.f32 %v908_v25, %v907_v24 }
 0x4e0   : > { %v910_v28 = vrot.slane %v909_v27, 2 }
 0x4e2   : > { %v911_v29 = vadd.f32 %v910_v28, %v909_v27 }
 0x4e4   : > { %v912_v26 = vrot.slane %v911_v29, 1 }
 0x4e6   : > { %v1273_v31 = vpop.eup %1272  ;;  %v913_v32 = vadd.f32 %v912_v26, %v911_v29 }
 0x4e7   : > { %v777_v33 = vmul.f32 %v1273_v31, %v1271_v10 }
 0x4e8   : > { %v914_v15 = vadd.f32 %v1105_v30, %v913_v32 }
 0x4e9   : > { %1181 = vmatprep.subr.mxu0 %v777_v33 }
 0x4ea   : > { %1182 = vmatpush3.msra.mxu0 %v777_v33  ;;  %1106 = vst.msk [vmem:[%s1512_s29 + $0x1] sm:$0x1] %vm661_vm11, %v914_v15  ;;  %s1278_s29 = sshll.u32 %s1372_s25, 4  ;;  %s1279_s29 = int_to_ptr.vmem [resolvable:$false] %s1278_s29 }
 0x4eb   : > { %s1280_s20 = scalar_lea.vmem %s1279_s29, 64  ;;  %p1281_p6 = scmp.lt.s32.totalorder %s1661_s8, %s1279_s29 }
 0x4ec   : > { %p1282_p7 = scmp.lt.s32.totalorder %s1280_s20, %s1274_s19 }
 0x4ee   : > { %p1283_p8 = por %p1282_p7, %p1281_p6 }
 0x4f0   : > { %p1284_p10 = pnand %p1283_p8, %p1277_p5 }
 0x557   : > { %v804_v2 = vpop.trf.xlu0 }
 0x558   : > { %1183 = vmatprep.mubr.msk.f32.mxu0 %vm565_vm12, %v804_v2 }
 0x55b   : > { %v805_v34 = vpop.trf.xlu0 }
 0x55c   : > { %1184 = vmatmul.mubr.msk.f32.vlgmr.msra.gmra.mxu0 %vm565_vm12, %v805_v34 }
 0x55d   : > { %1287 = shalt.err (!%p1284_p10)
}
 0x55e   : > { %s1288_s30 = scalar_lea.hbm %s1659_s13, 32  ;;  %s1292_s18 = scalar_lea.hbm %s1728_s6, 64 }
 0x55f   : > { %p1289_p11 = scmp.ne.s32.totalorder %s1659_s13, %s1288_s30  ;;  %p1293_p0 = scmp.lt.s32.totalorder %s1659_s13, %s1728_s6 }
 0x560   : > { %p1294_p1 = scmp.lt.s32.totalorder %s1292_s18, %s1288_s30 }
 0x561   : > { %p1290_p12 = pnand %p1289_p11, %p1459_p3 }
 0x562   : > { %p1295_p2 = por %p1294_p1, %p1293_p0 }
 0x563   : > { %p1291_p13 = pneg %p1290_p12 }
 0x565   : > { %p1296_p4 = pnand %p1295_p2, %p1291_p13 }
 0x567   : > { %1299 = shalt.err (!%p1296_p4)
}
 0x568   : > { %s1373_s27 = smov 16   ;;  %s1374_s7 = smov 1   ;;  %v1100_v35 = vld [vmem:[%s1510_s21 + $0x18] sm:$0x7f]  ;;  %v1099_v37 = vld [vmem:[%s1510_s21 + $0x10] sm:$0xff] }
 0x569   : > { %1186 = dma.vmem_to_hbm [thread:$0]  (%p1459_p3), %s1661_s8, 32, %s1659_s13, %s1665_s16, %s1373_s27, %s1373_s27, %s1374_s7  }
 0x61c   : > { %v1185_v36 = vpop.f32.mrf.mxu0 }
 0x61d   : > { %v902_v38 = vadd.f32 %v1185_v36, %v1100_v35 }
 0x61e   : > { %v892_v39 = vpop.f32.mrf.mxu0 }
 0x61f   : > { %1104 = vst.msk [vmem:[%s1510_s21 + $0x18] sm:$0x7f] %vm650_vm13, %v902_v38  ;;  %v901_v40 = vadd.f32 %v1099_v37, %v892_v39 }
 0x621   : > { %1103 = vst.msk [vmem:[%s1510_s21 + $0x10] sm:$0xff] %vm506_vm6, %v901_v40 }
 0x622 PF: > { %s1747_s10 = sld [smem:[#allocation5_spill]]  ;;  %p1192_p5 = scmp.ge.s32.totalorder %s1366_s28, 2 }
 0x624   : > { %p1189_p6 = pnand %p1192_p5, %p1469_p9 }
 0x626   : > { %p1190_p7 = pneg %p1189_p6 }
 0x628   : > { %s961_s17 = sand.u32 1, %s1747_s10  }
 0x629   : > { %s962_s9 = scalar_lea.sflag [#allocation3], %s961_s17 }
 0x62a   : > { %1333 = dma.done.wait (%p1190_p7), %s962_s9, 32  }
 0x62b   : > { %1335 = vsyncadd (%p1190_p7), %s962_s9, 4294967264  ;;  %s20_s28 = sadd.s32 1, %s1366_s28   ;;  %s1749_s8 = sld [smem:[#allocation6_spill]] }
 0x62c   : > { %p17_p3 = scmp.ge.s32.totalorder %s20_s28, 6   ;;  %s1750_s23 = sld [smem:[#allocation12_spill]] }
 0x62d   : > { %s1751_s24 = sld [smem:[#allocation7_spill]]  ;;  %s1755_s21 = smov %s1342_s22 }
 0x62e   : > { %s1752_s25 = sld [smem:[#allocation8_spill]]  ;;  %19 = sbr.rel (!%p17_p3) target bundleno = 5 (0x5), region = 99 }
 0x62f   : > { %s1753_s26 = sld [smem:[#allocation9_spill]] }
 0x630   : > { %s1754_s27 = sld [smem:[#allocation10_spill]] }
 0x631   : > { %s1756_s22 = smov %s1749_s8 }
 0x633   :  { %967 = vsyncpa [#allocation3], 1 }
 0x634   :  { %969 = vsyncpa [#allocation3 + $0x1], 1 }

</bundles_post_ra>
